<compile_context>
chip_gen: v5e
topology: v5e:2x2
jax: 0.10.0
libtpu: 0.0.40
codegen_flags: <defaults>
</compile_context>

<pallas_src>
import jax
import jax.numpy as jnp
from jax.experimental import pallas as pl
from jax.experimental.pallas import tpu as pltpu

_LANE = 128
_LANE_CANDIDATES = (2048, 1024, 512, 256, 128)


def _brelu_kernel(b_ref, x_ref, o_ref):
    x = x_ref[...]
    zero = jnp.zeros((), dtype=x.dtype)
    hi = b_ref[0, 0].astype(x.dtype)
    o_ref[...] = jnp.minimum(jnp.maximum(x, zero), hi)


def _default_block_bytes():
    """Per-generation block budget (in+out double-buffered -> ~4x this in VMEM)."""
    try:
        vmem_bytes = getattr(pltpu.get_tpu_info(), "vmem_capacity_bytes", None)
    except Exception:
        vmem_bytes = None
    if not vmem_bytes:
        vmem_bytes = 64 << 20  # assume smallest (v7x-like) VMEM if query fails
    # 4 MiB blocks on all current generations; scale down if VMEM ever shrinks.
    return int(min(4 << 20, max(1 << 20, vmem_bytes // 16)))


def _brelu_2d(x2d, boundary, *, target_block_bytes):
    """Clamp a lane-dense (rows, lane) slab; lane must be a multiple of 128."""
    rows, lane = x2d.shape
    dtype = x2d.dtype
    itemsize = jnp.dtype(dtype).itemsize
    # Sub-32-bit dtypes pack 2/4 rows per sublane; keep blocks whole packed vregs.
    sub = 8 * max(1, 4 // itemsize)

    if rows <= sub:
        tile_rows = rows  # tiny slab: single full-extent block
    else:
        tile_rows = max(sub, (target_block_bytes // (lane * itemsize)) // sub * sub)
        # Keep the grid at least ~4 steps deep so DMA in/out pipelining engages
        # and v7x's two TensorCores both get work on mid-size tensors.
        min_steps = 4
        if rows >= min_steps * sub:
            cap = max(sub, (rows // min_steps) // sub * sub)
            tile_rows = min(tile_rows, cap)
        else:
            tile_rows = sub
    grid = (pl.cdiv(rows, tile_rows),)

    b = jnp.asarray(boundary, dtype=jnp.float32).reshape(1, 1)
    n = rows * lane
    cost = pl.CostEstimate(flops=2 * n, transcendentals=0,
                           bytes_accessed=2 * n * itemsize)

    return pl.pallas_call(
        _brelu_kernel,
        out_shape=jax.ShapeDtypeStruct((rows, lane), dtype),
        grid_spec=pltpu.PrefetchScalarGridSpec(
            num_scalar_prefetch=0,
            grid=grid,
            in_specs=[
                pl.BlockSpec(memory_space=pltpu.MemorySpace.SMEM),
                pl.BlockSpec((tile_rows, lane), lambda i: (i, 0)),
            ],
            out_specs=pl.BlockSpec((tile_rows, lane), lambda i: (i, 0)),
        ),
        compiler_params=pltpu.CompilerParams(
            dimension_semantics=("parallel",),
            vmem_limit_bytes=32 << 20,
        ),
        cost_estimate=cost,
    )(b, x2d)


def brelu(x, boundary, *, target_block_bytes=None):
    """clamp(x, 0, boundary); same shape/dtype as x (BRelu.forward)."""
    orig_shape = x.shape
    dtype = x.dtype
    n = x.size
    if n == 0:
        return x
    if target_block_bytes is None:
        target_block_bytes = _default_block_bytes()

    x_flat = jnp.ravel(x)

    # Widest lane-dense last dim (multiple of 128) dividing the element count:
    # the tensor is then read once and written once, no padding copies.
    lane = next((w for w in _LANE_CANDIDATES if n % w == 0), None)
    if lane is not None:
        out2d = _brelu_2d(x_flat.reshape(n // lane, lane), boundary,
                          target_block_bytes=target_block_bytes)
        return out2d.reshape(orig_shape)

    # Rare ragged path (element count not a multiple of 128): kernel on the
    # multiple-of-128 prefix, <128-element tail clamped in plain jnp.
    m = (n // _LANE) * _LANE
    lo = jnp.zeros((), dtype=dtype)
    hi = jnp.asarray(boundary, dtype=jnp.float32).astype(dtype)
    tail_out = jnp.minimum(jnp.maximum(x_flat[m:], lo), hi)
    if m == 0:
        return tail_out.reshape(orig_shape)  # tensor smaller than one lane
    prefix_out = _brelu_2d(x_flat[:m].reshape(m // _LANE, _LANE), boundary,
                           target_block_bytes=target_block_bytes)
    return jnp.concatenate([prefix_out.reshape(-1), tail_out]).reshape(orig_shape)


def brelu_ref(x, boundary):
    return jnp.clip(x, 0.0, boundary)


if __name__ == "__main__":
    key = jax.random.PRNGKey(0)
    boundary = 1.0  # BRelu(boundary) constructor argument

    # NCHW conv-activation-like input (module's typical use).
    x = jax.random.normal(key, (2, 4, 16, 16), dtype=jnp.float32) * 3.0
    out = jax.block_until_ready(brelu(x, boundary))
    ref = brelu_ref(x, boundary)
    assert out.shape == x.shape and out.dtype == x.dtype
    assert jnp.array_equal(out, ref), "mismatch vs reference (main path)"

    k1, k2, k3 = jax.random.split(key, 3)

    # Multi-grid-step path (f32, 4 steps of (16, 2048) blocks).
    x_big = jax.random.normal(k1, (4, 128, 256), dtype=jnp.float32) * 3.0
    assert jnp.array_equal(jax.block_until_ready(brelu(x_big, boundary)),
                           brelu_ref(x_big, boundary)), "mismatch (multi-step)"

    # Packed-dtype path (bf16 -> 16-row sublane granularity, 2 grid steps).
    x_bf16 = (jax.random.normal(k2, (8, 64, 128), dtype=jnp.float32) * 3.0
              ).astype(jnp.bfloat16)
    out_bf16 = jax.block_until_ready(brelu(x_bf16, boundary))
    assert out_bf16.dtype == jnp.bfloat16
    assert jnp.array_equal(out_bf16, brelu_ref(x_bf16, boundary)), \
        "mismatch vs reference (bf16 path)"

    # Non-multiple-of-128 ragged fallback path (prefix kernel + jnp tail).
    x_odd = jax.random.normal(k3, (5, 7, 9), dtype=jnp.float32) * 3.0
    assert jnp.array_equal(jax.block_until_ready(brelu(x_odd, boundary)),
                           brelu_ref(x_odd, boundary)), \
        "mismatch vs reference (fallback path)"

    print("KERNEL_OK")
</pallas_src>

<mosaic_0001>
module attributes {stable_mosaic.version = 11 : i64} {
  func.func @_brelu_kernel(%arg0: i32, %arg1: memref<1x1xf32, #tpu.memory_space<smem>>, %arg2: memref<1x2048xf32, #tpu.memory_space<vmem>>, %arg3: memref<1x2048xf32, #tpu.memory_space<vmem>>) attributes {dimension_semantics = [#tpu.dimension_semantics<parallel>], iteration_bounds = array<i64: 1>, scalar_prefetch = 0 : i64, scratch_operands = 0 : i64, tpu.core_type = #tpu.core_type<tc>, window_params = [{transform_indices = @transform_0, window_bounds = array<i64: 1, 1>}, {transform_indices = @transform_1, window_bounds = array<i64: 1, 2048>}, {transform_indices = @transform_2, window_bounds = array<i64: 1, 2048>}]} {
    %c0 = arith.constant 0 : index
    %c0_0 = arith.constant 0 : index
    %0 = vector.load %arg2[%c0, %c0_0] : memref<1x2048xf32, #tpu.memory_space<vmem>>, vector<1x2048xf32>
    %c0_1 = arith.constant 0 : index
    %c0_2 = arith.constant 0 : index
    %1 = memref.load %arg1[%c0_1, %c0_2] : memref<1x1xf32, #tpu.memory_space<smem>>
    %cst = arith.constant 0.000000e+00 : f32
    %2 = vector.broadcast %cst : f32 to vector<1x2048xf32>
    %3 = arith.maximumf %0, %2 : vector<1x2048xf32>
    %4 = vector.broadcast %1 : f32 to vector<1x2048xf32>
    %5 = arith.minimumf %3, %4 : vector<1x2048xf32>
    %c0_3 = arith.constant 0 : index
    %c0_4 = arith.constant 0 : index
    %6 = vector.load %arg3[%c0_3, %c0_4] : memref<1x2048xf32, #tpu.memory_space<vmem>>, vector<1x2048xf32>
    tpu.vector_store %arg3[%c0_3, %c0_4], %5 {strides = array<i32>} : memref<1x2048xf32, #tpu.memory_space<vmem>>, vector<1x2048xf32>,
    return
  }
  func.func @transform_0(%arg0: i32) -> (i32, i32) {
    %c0_i32 = arith.constant 0 : i32
    %c0_i32_0 = arith.constant 0 : i32
    %c0_i32_1 = arith.constant 0 : i32
    return %c0_i32, %c0_i32_0 : i32, i32
  }
  func.func @transform_1(%arg0: i32) -> (i32, i32) {
    %c0_i32 = arith.constant 0 : i32
    %c0_i32_0 = arith.constant 0 : i32
    return %arg0, %c0_i32 : i32, i32
  }
  func.func @transform_2(%arg0: i32) -> (i32, i32) {
    %c0_i32 = arith.constant 0 : i32
    %c0_i32_0 = arith.constant 0 : i32
    return %arg0, %c0_i32 : i32, i32
  }
}

</mosaic_0001>

<bundles_post_ra>
// kernel: tpu_custom_call.1
= control target key start
LH: loop header
LB: loop body
LE: loop exit
PB: predicated region body
PF: predicated region fallthrough
CT: control target
= control target key end

     0   :  { %8 = vsyncpa [#allocation4], 0  ;;  %s134_s0 = inlined_call_operand.<no memory space> [shape: f32[1,1], index: 0, kind: input, shape index: {}]   ;;  %s135_s1 = inlined_call_operand.hbm [shape: f32[1,2048], index: 1, kind: input, shape index: {}]   ;;  %s136_s2 = inlined_call_operand.hbm [shape: f32[1,2048], index: 2, kind: output, shape index: {}]  }
   0x1   :  { %9 = vsyncpa [#allocation5], 0  ;;  %s17_s11 = sshll.u32 %s135_s1, 4  ;;  %s108_s12 = smov [#allocation3]   ;;  %s18_s11 = int_to_ptr.hbm [resolvable:$true] %s17_s11 }
   0x2   :  { %s19_s13 = sshll.u32 %s108_s12, 4  ;;  %s20_s13 = int_to_ptr.vmem [resolvable:$true] %s19_s13 }
   0x3   :  { %22 = dma.hbm_to_vmem [thread:$0]  %s18_s11, 256, %s20_s13, [#allocation4]  }
   0x4   :  { %104 = dma.done.wait [#allocation4], 256  }
   0x5   :  { %105 = vsyncadd [#allocation4], 4294967040  ;;  %v27_v0 = vld [vmem:[#allocation3] sm:$0xff]  ;;  %v32_v1 = vstv %s134_s0  ;;  %v28_v2 = vld [vmem:[#allocation3 + $0x8] sm:$0xff]  ;;  %s109_s16 = smov [#allocation6]   ;;  %s44_s1 = sshll.u32 %s136_s2, 4  ;;  %s45_s1 = int_to_ptr.hbm [resolvable:$true] %s44_s1 }
   0x6   :  { %v30_v3 = vmax.f32 %v27_v0, 0.0  ;;  %v31_v4 = vmax.f32 %v28_v2, 0.0  ;;  %s42_s17 = sshll.u32 %s109_s16, 4  ;;  %s43_s17 = int_to_ptr.vmem [resolvable:$true] %s42_s17 }
   0x8   :  { %v33_v5 = vmin.f32 %v30_v3, %v32_v1  ;;  %v34_v6 = vmin.f32 %v31_v4, %v32_v1 }
   0xa   :  { %35 = vst [vmem:[#allocation6] sm:$0xff] %v33_v5 }
   0xb   :  { %36 = vst [vmem:[#allocation6 + $0x8] sm:$0xff] %v34_v6 }
   0xc   :  { %47 = dma.vmem_to_hbm [thread:$0]  %s43_s17, 256, %s45_s1, [#allocation5]  }
   0xd   :  { %106 = dma.done.wait [#allocation5], 256  }
   0xe   :  { %107 = vsyncadd [#allocation5], 4294967040 }
   0xf   :  { %52 = vsyncpa [#allocation4], 1 }
  0x10   :  { %53 = vsyncpa [#allocation5], 1 }

</bundles_post_ra>
